<compile_context>
chip_gen: v7x
topology: tpu7x:2x2x1
jax: 0.10.0
libtpu: 0.0.40
codegen_flags: <defaults>
</compile_context>

<pallas_src>
import numpy as np
import jax
import jax.numpy as jnp
from jax.experimental import pallas as pl
from jax.experimental.pallas import tpu as pltpu


def _round_up(x, m):
    return ((x + m - 1) // m) * m


def mln_kernel(p_ref, idx_ref, ab_ref, c_ref, w_ref, cnt_ref, out_ref):
    r = pl.program_id(0)       # rule index
    gt = pl.program_id(1)      # grounding-tile index

    @pl.when(jnp.logical_and(r == 0, gt == 0))
    def _init():
        out_ref[...] = jnp.zeros_like(out_ref)

    K, GT = idx_ref.shape
    p_row = p_ref[...]                                                # [1, Vp]  (hoisted)
    Vp = p_row.shape[1]
    viota = jax.lax.broadcasted_iota(jnp.int32, (Vp, GT), 0)          # hoisted out of k-loop

    # prod_k z[latent_neg_mask[k], k]  with padded slots contributing a factor of 1
    prod = jnp.ones((1, GT), jnp.float32)
    for k in range(K):                                                # K small & static -> unrolled
        onehot = (viota == idx_ref[k:k + 1, :]).astype(jnp.float32)   # [Vp, GT]
        g = jnp.dot(p_row, onehot,
                    preferred_element_type=jnp.float32)               # gathered p, [1, GT] (MXU)
        prod = prod * (ab_ref[k:k + 1, :] + ab_ref[K + k:K + k + 1, :] * g)

    # cart.sum() per grounding: c0 + c1*prod (= 1 - obs_zero*prod; padded groundings give 0)
    contrib = c_ref[0:1, :] + c_ref[1:2, :] * prod                    # [1, GT]
    tile_sum = jnp.sum(contrib, axis=1, keepdims=True)                # [1, 1]

    w_r = w_ref[r]                                                    # scalar SMEM read

    @pl.when(gt == 0)
    def _add_cnt():                                                   # w[r]*observed_rule_cnts[r]
        out_ref[...] += w_r * cnt_ref[r]

    out_ref[...] += w_r * tile_sum                                    # fold rule_weights_lin in


def conditional_mln_forward(posterior_prob, idx, ab, c, rule_w, obs_cnts, g_tile):
    R, K, G_pad = idx.shape
    GT = g_tile
    n_gt = G_pad // GT
    V = posterior_prob.shape[0]
    Vp = _round_up(max(V, 1), 128)
    p_pad = jnp.zeros((1, Vp), jnp.float32).at[0, :V].set(
        posterior_prob.astype(jnp.float32))

    smem = pl.BlockSpec(memory_space=pltpu.MemorySpace.SMEM)
    out = pl.pallas_call(
        mln_kernel,
        out_shape=jax.ShapeDtypeStruct((1, 1), jnp.float32),
        grid=(R, n_gt),
        in_specs=[
            pl.BlockSpec((1, Vp), lambda r, g: (0, 0)),               # posterior probs
            pl.BlockSpec((None, K, GT), lambda r, g: (r, 0, g)),      # latent var indices
            pl.BlockSpec((None, 2 * K, GT), lambda r, g: (r, 0, g)),  # affine coeffs a;b
            pl.BlockSpec((None, 2, GT), lambda r, g: (r, 0, g)),      # affine coeffs c0;c1
            smem,                                                     # rule weights (R,)
            smem,                                                     # observed counts (R,)
        ],
        out_specs=pl.BlockSpec((1, 1), lambda r, g: (0, 0)),
        compiler_params=pltpu.CompilerParams(
            dimension_semantics=("arbitrary", "arbitrary")),
    )(p_pad,
      idx.astype(jnp.int32),
      ab.astype(jnp.float32),
      c.astype(jnp.float32),
      rule_w.reshape(-1).astype(jnp.float32),
      obs_cnts.reshape(-1).astype(jnp.float32))
    return out.reshape(1)                 # matches nn.Linear(R, 1) output shape (1,)


# ------------------------- host-side packing of the ragged MLN structure ---------------

def pack_inputs(latent_var_inds_ls_ls, neg_mask_ls_ls, g_tile=512):
    R = len(latent_var_inds_ls_ls)
    G = max(len(gs) for gs in latent_var_inds_ls_ls)
    K = max(len(inds) for rule in latent_var_inds_ls_ls for inds in rule)
    G_pad = _round_up(max(G, 1), 128)
    gt = min(g_tile, G_pad)
    G_pad = _round_up(G_pad, gt)

    idx = np.zeros((R, K, G_pad), np.int32)
    a = np.ones((R, K, G_pad), np.float32)     # padded latent slots -> factor 1
    b = np.zeros((R, K, G_pad), np.float32)
    c = np.zeros((R, 2, G_pad), np.float32)    # padded groundings -> contrib 0
    for i in range(R):
        for j, (inds, (lneg, oneg)) in enumerate(
                zip(latent_var_inds_ls_ls[i], neg_mask_ls_ls[i])):
            kk = len(inds)
            ln = np.asarray(lneg, np.float32)
            idx[i, :kk, j] = inds
            a[i, :kk, j] = 1.0 - ln            # neg==1 -> p ; neg==0 -> 1-p
            b[i, :kk, j] = 2.0 * ln - 1.0
            c[i, 0, j] = 1.0                   # valid grounding
            c[i, 1, j] = -1.0 if sum(oneg) == 0 else 0.0
    ab = np.concatenate([a, b], axis=1)        # [R, 2K, G_pad]
    return idx, ab, c, gt


# ------------------------- pure-numpy reference (mirrors the PyTorch loop) -------------

def reference_forward(neg_mask_ls_ls, latent_var_inds_ls_ls, observed_rule_cnts,
                      posterior_prob, rule_w):
    R = len(neg_mask_ls_ls)
    scores = np.zeros(R, np.float64)
    for i in range(R):
        for j in range(len(neg_mask_ls_ls[i])):
            latent_neg_mask, observed_neg_mask = neg_mask_ls_ls[i][j]
            inds = latent_var_inds_ls_ls[i][j]
            p = posterior_prob[inds]
            z = np.stack([1.0 - p, p], axis=0)           # [2, K]
            cart = z[:, 0]
            for k in range(1, z.shape[1]):
                cart = np.outer(cart, z[:, k]).reshape(-1)
            cart = cart.reshape([2] * len(latent_neg_mask))
            if sum(observed_neg_mask) == 0:
                cart[tuple(latent_neg_mask)] = 0.0
            scores[i] += cart.sum()
        scores[i] += observed_rule_cnts[i]
    return (rule_w @ scores).reshape(1)                  # shape (1,)


if __name__ == "__main__":
    # Small deterministic problem: 4 rules, 16 latent variables.
    R, V = 4, 16
    PRED_DICT = {f"pred_{i}": None for i in range(6)}    # only needed for alpha_table shape

    latent_var_inds_ls_ls = [
        [[0, 3, 5], [1, 2], [4, 7, 9, 11]],
        [[2, 6], [8, 10, 12], [0, 1, 2, 3], [13], [5, 14]],
        [[15, 4], [3, 9, 12]],
        [[6, 7, 8, 9], [10, 11], [1, 5, 13], [14, 15]],
    ]
    # (latent_neg_mask, observed_neg_mask) per grounding
    neg_mask_ls_ls = [
        [([1, 0, 1], [0, 0]), ([0, 1], [1, 0]), ([1, 1, 0, 1], [0, 0, 0])],
        [([0, 1], [0]), ([1, 0, 0], [0, 1]), ([1, 1, 1, 1], [0, 0]),
         ([1], [0]), ([0, 0], [1, 1])],
        [([1, 0], [0, 0, 0]), ([0, 1, 1], [1])],
        [([1, 0, 1, 0], [0]), ([1, 1], [0, 0]), ([0, 1, 0], [1]), ([1, 0], [0])],
    ]

    key = jax.random.PRNGKey(0)
    k1, k2 = jax.random.split(key)
    posterior_prob = jax.random.uniform(k1, (V,), minval=0.05, maxval=0.95,
                                        dtype=jnp.float32)
    observed_rule_cnts = jax.random.uniform(k2, (R,), minval=0.0, maxval=3.0,
                                            dtype=jnp.float32)

    # Deterministic "rule.weight" values (rule_weights_lin.weight, shape [1, R]).
    rule_w = jnp.array([[0.5, -1.0, 2.0, 1.5]], dtype=jnp.float32)
    # alpha_table exists in the module but is dead code for soft_logic=False.
    alpha_table = jnp.full((len(PRED_DICT),), 10.0, dtype=jnp.float32)  # unused
    # TODO(synk): soft_logic=True branch (sigmoid(alpha_table) scoring) not implemented.

    idx, ab, c, g_tile = pack_inputs(latent_var_inds_ls_ls, neg_mask_ls_ls)

    out = conditional_mln_forward(
        posterior_prob, jnp.asarray(idx), jnp.asarray(ab), jnp.asarray(c),
        rule_w, observed_rule_cnts, g_tile)
    out = jax.block_until_ready(out)

    ref = reference_forward(neg_mask_ls_ls, latent_var_inds_ls_ls,
                            np.asarray(observed_rule_cnts, np.float64),
                            np.asarray(posterior_prob, np.float64),
                            np.asarray(rule_w, np.float64))

    if np.allclose(np.asarray(out, np.float64), ref, rtol=1e-5, atol=1e-5):
        print("KERNEL_OK")
    else:
        raise SystemExit(f"MISMATCH: kernel={np.asarray(out)} ref={ref}")
</pallas_src>

<mosaic_0001>
module attributes {stable_mosaic.version = 11 : i64} {
  func.func @mln_kernel(%arg0: i32, %arg1: i32, %arg2: memref<1x128xf32, #tpu.memory_space<vmem>>, %arg3: memref<1x4x128xi32, #tpu.memory_space<vmem>>, %arg4: memref<1x8x128xf32, #tpu.memory_space<vmem>>, %arg5: memref<1x2x128xf32, #tpu.memory_space<vmem>>, %arg6: memref<4xf32, #tpu.memory_space<smem>>, %arg7: memref<4xf32, #tpu.memory_space<smem>>, %arg8: memref<1x1xf32, #tpu.memory_space<vmem>>) attributes {dimension_semantics = [#tpu.dimension_semantics<arbitrary>, #tpu.dimension_semantics<arbitrary>], iteration_bounds = array<i64: 4, 1>, scalar_prefetch = 0 : i64, scratch_operands = 0 : i64, tpu.core_type = #tpu.core_type<tc>, window_params = [{pipeline_mode = #tpu.pipeline_mode<synchronous>, transform_indices = @transform_0, window_bounds = array<i64: 1, 128>}, {transform_indices = @transform_1, window_bounds = array<i64: 1, 4, 128>}, {transform_indices = @transform_2, window_bounds = array<i64: 1, 8, 128>}, {transform_indices = @transform_3, window_bounds = array<i64: 1, 2, 128>}, {transform_indices = @transform_4, window_bounds = array<i64: 4>}, {transform_indices = @transform_5, window_bounds = array<i64: 4>}, {pipeline_mode = #tpu.pipeline_mode<synchronous>, transform_indices = @transform_6, window_bounds = array<i64: 1, 1>}]} {
    %c0_i32 = arith.constant 0 : i32
    %0 = arith.cmpi eq, %arg0, %c0_i32 : i32
    %c0_i32_0 = arith.constant 0 : i32
    %1 = arith.cmpi eq, %arg1, %c0_i32_0 : i32
    %2 = arith.andi %0, %1 : i1
    %3 = arith.extui %2 : i1 to i32
    %c0_i32_1 = arith.constant 0 : i32
    %4 = arith.cmpi ne, %3, %c0_i32_1 : i32
    scf.if %4 {
      %cst_49 = arith.constant 0.000000e+00 : f32
      %82 = vector.broadcast %cst_49 : f32 to vector<1x1xf32>
      %c0_50 = arith.constant 0 : index
      %c0_51 = arith.constant 0 : index
      %83 = vector.load %arg8[%c0_50, %c0_51] : memref<1x1xf32, #tpu.memory_space<vmem>>, vector<1x1xf32>
      tpu.vector_store %arg8[%c0_50, %c0_51], %82 {strides = array<i32>} : memref<1x1xf32, #tpu.memory_space<vmem>>, vector<1x1xf32>,
    } else {
    }
    %c0 = arith.constant 0 : index
    %c0_2 = arith.constant 0 : index
    %5 = vector.load %arg2[%c0, %c0_2] : memref<1x128xf32, #tpu.memory_space<vmem>>, vector<1x128xf32>
    %6 = tpu.iota {dimensions = array<i32: 0>} : vector<128x128xi32>
    %cst = arith.constant 1.000000e+00 : f32
    %7 = vector.broadcast %cst : f32 to vector<1x128xf32>
    %c0_3 = arith.constant 0 : index
    %c0_4 = arith.constant 0 : index
    %c0_5 = arith.constant 0 : index
    %8 = vector.load %arg3[%c0_3, %c0_4, %c0_5] : memref<1x4x128xi32, #tpu.memory_space<vmem>>, vector<1x1x128xi32>
    %9 = vector.shape_cast %8 : vector<1x1x128xi32> to vector<1x128xi32>
    %10 = vector.broadcast %9 : vector<1x128xi32> to vector<128x128xi32>
    %11 = arith.cmpi eq, %6, %10 : vector<128x128xi32>
    %12 = arith.extui %11 : vector<128x128xi1> to vector<128x128xi32>
    %13 = arith.sitofp %12 : vector<128x128xi32> to vector<128x128xf32>
    %cst_6 = arith.constant dense<0.000000e+00> : vector<1x128xf32>
    %14 = tpu.matmul %5, %13, %cst_6 {dimension_numbers = #tpu.dot_dimension_numbers<[1], [0], [0], [1], [0, 0, 1, 1], [], []>} : vector<1x128xf32>, vector<128x128xf32>, vector<1x128xf32> -> vector<1x128xf32>
    %c0_7 = arith.constant 0 : index
    %c0_8 = arith.constant 0 : index
    %c0_9 = arith.constant 0 : index
    %15 = vector.load %arg4[%c0_7, %c0_8, %c0_9] : memref<1x8x128xf32, #tpu.memory_space<vmem>>, vector<1x1x128xf32>
    %16 = vector.shape_cast %15 : vector<1x1x128xf32> to vector<1x128xf32>
    %c0_10 = arith.constant 0 : index
    %c4 = arith.constant 4 : index
    %c0_11 = arith.constant 0 : index
    %17 = vector.load %arg4[%c0_10, %c4, %c0_11] : memref<1x8x128xf32, #tpu.memory_space<vmem>>, vector<1x1x128xf32>
    %18 = vector.shape_cast %17 : vector<1x1x128xf32> to vector<1x128xf32>
    %19 = arith.mulf %18, %14 : vector<1x128xf32>
    %20 = arith.addf %16, %19 : vector<1x128xf32>
    %21 = arith.mulf %7, %20 : vector<1x128xf32>
    %c0_12 = arith.constant 0 : index
    %c1 = arith.constant 1 : index
    %c0_13 = arith.constant 0 : index
    %22 = vector.load %arg3[%c0_12, %c1, %c0_13] : memref<1x4x128xi32, #tpu.memory_space<vmem>>, vector<1x1x128xi32>
    %23 = vector.shape_cast %22 : vector<1x1x128xi32> to vector<1x128xi32>
    %24 = vector.broadcast %23 : vector<1x128xi32> to vector<128x128xi32>
    %25 = arith.cmpi eq, %6, %24 : vector<128x128xi32>
    %26 = arith.extui %25 : vector<128x128xi1> to vector<128x128xi32>
    %27 = arith.sitofp %26 : vector<128x128xi32> to vector<128x128xf32>
    %cst_14 = arith.constant dense<0.000000e+00> : vector<1x128xf32>
    %28 = tpu.matmul %5, %27, %cst_14 {dimension_numbers = #tpu.dot_dimension_numbers<[1], [0], [0], [1], [0, 0, 1, 1], [], []>} : vector<1x128xf32>, vector<128x128xf32>, vector<1x128xf32> -> vector<1x128xf32>
    %c0_15 = arith.constant 0 : index
    %c1_16 = arith.constant 1 : index
    %c0_17 = arith.constant 0 : index
    %29 = vector.load %arg4[%c0_15, %c1_16, %c0_17] : memref<1x8x128xf32, #tpu.memory_space<vmem>>, vector<1x1x128xf32>
    %30 = vector.shape_cast %29 : vector<1x1x128xf32> to vector<1x128xf32>
    %c0_18 = arith.constant 0 : index
    %c5 = arith.constant 5 : index
    %c0_19 = arith.constant 0 : index
    %31 = vector.load %arg4[%c0_18, %c5, %c0_19] : memref<1x8x128xf32, #tpu.memory_space<vmem>>, vector<1x1x128xf32>
    %32 = vector.shape_cast %31 : vector<1x1x128xf32> to vector<1x128xf32>
    %33 = arith.mulf %32, %28 : vector<1x128xf32>
    %34 = arith.addf %30, %33 : vector<1x128xf32>
    %35 = arith.mulf %21, %34 : vector<1x128xf32>
    %c0_20 = arith.constant 0 : index
    %c2 = arith.constant 2 : index
    %c0_21 = arith.constant 0 : index
    %36 = vector.load %arg3[%c0_20, %c2, %c0_21] : memref<1x4x128xi32, #tpu.memory_space<vmem>>, vector<1x1x128xi32>
    %37 = vector.shape_cast %36 : vector<1x1x128xi32> to vector<1x128xi32>
    %38 = vector.broadcast %37 : vector<1x128xi32> to vector<128x128xi32>
    %39 = arith.cmpi eq, %6, %38 : vector<128x128xi32>
    %40 = arith.extui %39 : vector<128x128xi1> to vector<128x128xi32>
    %41 = arith.sitofp %40 : vector<128x128xi32> to vector<128x128xf32>
    %cst_22 = arith.constant dense<0.000000e+00> : vector<1x128xf32>
    %42 = tpu.matmul %5, %41, %cst_22 {dimension_numbers = #tpu.dot_dimension_numbers<[1], [0], [0], [1], [0, 0, 1, 1], [], []>} : vector<1x128xf32>, vector<128x128xf32>, vector<1x128xf32> -> vector<1x128xf32>
    %c0_23 = arith.constant 0 : index
    %c2_24 = arith.constant 2 : index
    %c0_25 = arith.constant 0 : index
    %43 = vector.load %arg4[%c0_23, %c2_24, %c0_25] : memref<1x8x128xf32, #tpu.memory_space<vmem>>, vector<1x1x128xf32>
    %44 = vector.shape_cast %43 : vector<1x1x128xf32> to vector<1x128xf32>
    %c0_26 = arith.constant 0 : index
    %c6 = arith.constant 6 : index
    %c0_27 = arith.constant 0 : index
    %45 = vector.load %arg4[%c0_26, %c6, %c0_27] : memref<1x8x128xf32, #tpu.memory_space<vmem>>, vector<1x1x128xf32>
    %46 = vector.shape_cast %45 : vector<1x1x128xf32> to vector<1x128xf32>
    %47 = arith.mulf %46, %42 : vector<1x128xf32>
    %48 = arith.addf %44, %47 : vector<1x128xf32>
    %49 = arith.mulf %35, %48 : vector<1x128xf32>
    %c0_28 = arith.constant 0 : index
    %c3 = arith.constant 3 : index
    %c0_29 = arith.constant 0 : index
    %50 = vector.load %arg3[%c0_28, %c3, %c0_29] : memref<1x4x128xi32, #tpu.memory_space<vmem>>, vector<1x1x128xi32>
    %51 = vector.shape_cast %50 : vector<1x1x128xi32> to vector<1x128xi32>
    %52 = vector.broadcast %51 : vector<1x128xi32> to vector<128x128xi32>
    %53 = arith.cmpi eq, %6, %52 : vector<128x128xi32>
    %54 = arith.extui %53 : vector<128x128xi1> to vector<128x128xi32>
    %55 = arith.sitofp %54 : vector<128x128xi32> to vector<128x128xf32>
    %cst_30 = arith.constant dense<0.000000e+00> : vector<1x128xf32>
    %56 = tpu.matmul %5, %55, %cst_30 {dimension_numbers = #tpu.dot_dimension_numbers<[1], [0], [0], [1], [0, 0, 1, 1], [], []>} : vector<1x128xf32>, vector<128x128xf32>, vector<1x128xf32> -> vector<1x128xf32>
    %c0_31 = arith.constant 0 : index
    %c3_32 = arith.constant 3 : index
    %c0_33 = arith.constant 0 : index
    %57 = vector.load %arg4[%c0_31, %c3_32, %c0_33] : memref<1x8x128xf32, #tpu.memory_space<vmem>>, vector<1x1x128xf32>
    %58 = vector.shape_cast %57 : vector<1x1x128xf32> to vector<1x128xf32>
    %c0_34 = arith.constant 0 : index
    %c7 = arith.constant 7 : index
    %c0_35 = arith.constant 0 : index
    %59 = vector.load %arg4[%c0_34, %c7, %c0_35] : memref<1x8x128xf32, #tpu.memory_space<vmem>>, vector<1x1x128xf32>
    %60 = vector.shape_cast %59 : vector<1x1x128xf32> to vector<1x128xf32>
    %61 = arith.mulf %60, %56 : vector<1x128xf32>
    %62 = arith.addf %58, %61 : vector<1x128xf32>
    %63 = arith.mulf %49, %62 : vector<1x128xf32>
    %c0_36 = arith.constant 0 : index
    %c0_37 = arith.constant 0 : index
    %c0_38 = arith.constant 0 : index
    %64 = vector.load %arg5[%c0_36, %c0_37, %c0_38] : memref<1x2x128xf32, #tpu.memory_space<vmem>>, vector<1x1x128xf32>
    %65 = vector.shape_cast %64 : vector<1x1x128xf32> to vector<1x128xf32>
    %c0_39 = arith.constant 0 : index
    %c1_40 = arith.constant 1 : index
    %c0_41 = arith.constant 0 : index
    %66 = vector.load %arg5[%c0_39, %c1_40, %c0_41] : memref<1x2x128xf32, #tpu.memory_space<vmem>>, vector<1x1x128xf32>
    %67 = vector.shape_cast %66 : vector<1x1x128xf32> to vector<1x128xf32>
    %68 = arith.mulf %67, %63 : vector<1x128xf32>
    %69 = arith.addf %65, %68 : vector<1x128xf32>
    %cst_42 = arith.constant dense<0.000000e+00> : vector<1xf32>
    %70 = vector.multi_reduction <add>, %69, %cst_42 [1] : vector<1x128xf32> to vector<1xf32>
    %71 = vector.shape_cast %70 : vector<1xf32> to vector<1x1xf32>
    %72 = arith.index_cast %arg0 : i32 to index
    %73 = memref.load %arg6[%72] : memref<4xf32, #tpu.memory_space<smem>>
    %c0_i32_43 = arith.constant 0 : i32
    %74 = arith.cmpi eq, %arg1, %c0_i32_43 : i32
    %75 = arith.extui %74 : i1 to i32
    %c0_i32_44 = arith.constant 0 : i32
    %76 = arith.cmpi ne, %75, %c0_i32_44 : i32
    scf.if %76 {
      %c0_49 = arith.constant 0 : index
      %c0_50 = arith.constant 0 : index
      %82 = vector.load %arg8[%c0_49, %c0_50] : memref<1x1xf32, #tpu.memory_space<vmem>>, vector<1x1xf32>
      %83 = arith.index_cast %arg0 : i32 to index
      %84 = memref.load %arg7[%83] : memref<4xf32, #tpu.memory_space<smem>>
      %85 = arith.mulf %73, %84 : f32
      %86 = vector.broadcast %85 : f32 to vector<1x1xf32>
      %87 = arith.addf %82, %86 : vector<1x1xf32>
      %c0_51 = arith.constant 0 : index
      %c0_52 = arith.constant 0 : index
      %88 = vector.load %arg8[%c0_51, %c0_52] : memref<1x1xf32, #tpu.memory_space<vmem>>, vector<1x1xf32>
      tpu.vector_store %arg8[%c0_51, %c0_52], %87 {strides = array<i32>} : memref<1x1xf32, #tpu.memory_space<vmem>>, vector<1x1xf32>,
    } else {
    }
    %c0_45 = arith.constant 0 : index
    %c0_46 = arith.constant 0 : index
    %77 = vector.load %arg8[%c0_45, %c0_46] : memref<1x1xf32, #tpu.memory_space<vmem>>, vector<1x1xf32>
    %78 = vector.broadcast %73 : f32 to vector<1x1xf32>
    %79 = arith.mulf %78, %71 : vector<1x1xf32>
    %80 = arith.addf %77, %79 : vector<1x1xf32>
    %c0_47 = arith.constant 0 : index
    %c0_48 = arith.constant 0 : index
    %81 = vector.load %arg8[%c0_47, %c0_48] : memref<1x1xf32, #tpu.memory_space<vmem>>, vector<1x1xf32>
    tpu.vector_store %arg8[%c0_47, %c0_48], %80 {strides = array<i32>} : memref<1x1xf32, #tpu.memory_space<vmem>>, vector<1x1xf32>,
    return
  }
  func.func @transform_0(%arg0: i32, %arg1: i32) -> (i32, i32) {
    %c0_i32 = arith.constant 0 : i32
    %c0_i32_0 = arith.constant 0 : i32
    %c0_i32_1 = arith.constant 0 : i32
    return %c0_i32, %c0_i32_0 : i32, i32
  }
  func.func @transform_1(%arg0: i32, %arg1: i32) -> (i32, i32, i32) {
    %c0_i32 = arith.constant 0 : i32
    %c0_i32_0 = arith.constant 0 : i32
    return %arg0, %c0_i32, %arg1 : i32, i32, i32
  }
  func.func @transform_2(%arg0: i32, %arg1: i32) -> (i32, i32, i32) {
    %c0_i32 = arith.constant 0 : i32
    %c0_i32_0 = arith.constant 0 : i32
    return %arg0, %c0_i32, %arg1 : i32, i32, i32
  }
  func.func @transform_3(%arg0: i32, %arg1: i32) -> (i32, i32, i32) {
    %c0_i32 = arith.constant 0 : i32
    %c0_i32_0 = arith.constant 0 : i32
    return %arg0, %c0_i32, %arg1 : i32, i32, i32
  }
  func.func @transform_4(%arg0: i32, %arg1: i32) -> i32 {
    %c0_i32 = arith.constant 0 : i32
    %c0_i32_0 = arith.constant 0 : i32
    return %c0_i32 : i32
  }
  func.func @transform_5(%arg0: i32, %arg1: i32) -> i32 {
    %c0_i32 = arith.constant 0 : i32
    %c0_i32_0 = arith.constant 0 : i32
    return %c0_i32 : i32
  }
  func.func @transform_6(%arg0: i32, %arg1: i32) -> (i32, i32) {
    %c0_i32 = arith.constant 0 : i32
    %c0_i32_0 = arith.constant 0 : i32
    %c0_i32_1 = arith.constant 0 : i32
    return %c0_i32, %c0_i32_0 : i32, i32
  }
}

</mosaic_0001>

<bundles_post_ra>
// kernel: tpu_custom_call.1
= control target key start
LH: loop header
LB: loop body
LE: loop exit
PB: predicated region body
PF: predicated region fallthrough
CT: control target
= control target key end

     0   :  { %s2438_s0 = inlined_call_operand.hbm [shape: f32[1,128], index: 0, kind: input, shape index: {}]   ;;  %s2439_s1 = inlined_call_operand.hbm [shape: s32[4,4,128], index: 1, kind: input, shape index: {}]   ;;  %s2440_s2 = inlined_call_operand.hbm [shape: f32[4,8,128], index: 2, kind: input, shape index: {}]   ;;  %s2441_s3 = inlined_call_operand.vmem [shape: f32[4,2,128], index: 3, kind: input, shape index: {}]   ;;  %s2442_s4 = inlined_call_operand.vmem [shape: f32[4], index: 4, kind: input, shape index: {}]   ;;  %s2443_s5 = inlined_call_operand.vmem [shape: f32[4], index: 5, kind: input, shape index: {}]   ;;  %s2444_s6 = inlined_call_operand.hbm [shape: f32[1,1], index: 6, kind: output, shape index: {}]  }
   0x1   :  { %2451 = sst [smem:[#allocation18_spill]] %s2439_s1 }
   0x2   :  { %11 = vsyncpa [#allocation3], 0 }
   0x3   :  { %12 = vsyncpa [#allocation7], 0 }
   0x4   :  { %14 = vsyncpa [#allocation7 + $0x1], 0 }
   0x5   :  { %15 = vsyncpa [#allocation5], 0 }
   0x6   :  { %16 = vsyncpa [#allocation11], 0 }
   0x7   :  { %17 = vsyncpa [#allocation4], 0  ;;  %s1894_s21 = smov 0   ;;  %s1896_s22 = smov 0  }
   0x8   :  { %s1898_s23 = smov 0   ;;  %s1900_s24 = smov 0  }
   0x9   :  { %s1902_s25 = smov 0   ;;  %s1904_s26 = smov 0  }
   0xa LB: > { %s35_s27 = sadd.s32 1, %s1842_s25  ;;  %s65_s28 = sadd.s32 1, %s1834_s23  ;;  %s1846_s26 = sphi %s1904_s26, %s23_s26   ;;  %s1842_s25 = sphi %s1902_s25, %s2473_s25   ;;  %s1838_s24 = sphi %s1900_s24, %s2472_s24   ;;  %s1834_s23 = sphi %s1898_s23, %s2471_s23   ;;  %s1830_s22 = sphi %s1896_s22, %s2470_s22   ;;  %s1826_s21 = sphi %s1894_s21, %s2469_s21  }
   0xb   : > { %p37_p0 = scmp.ge.s32.totalorder %s35_s27, 4  ;;  %p72_p1 = scmp.ne.s32.totalorder %s1834_s23, %s1830_s22 }
   0xc   : > { %p73_p2 = scmp.eq.s32.totalorder %s1846_s26, 0  ;;  %p1573_p4 = scmp.lt.s32.totalorder %s1846_s26, 4 }
   0xd   : > { %s2475_s27 = smov (%p37_p0, %s35_s27), 0  ;;  %s254_s30 = sand.u32 1, %s1846_s26  }
   0xe   : > { %p74_p3 = por %p73_p2, %p72_p1  ;;  %s60_s29 = ssub.s32 %s1842_s25, %s2475_s27 }
   0xf   : > { %p63_p5 = scmp.eq.s32.totalorder %s60_s29, 0  ;;  %s256_s7 = sand.u32 1, %s1834_s23  }
  0x10   : > { %s1081_s8 = sshll.u32 %s1842_s25, 6  ;;  %s1080_s10 = sshll.u32 %s256_s7, 2 }
  0x11   : > { %s1938_s9 = scalar_select %p63_p5, %s1834_s23, %s65_s28  }
  0x12   : > { %s2452_s1 = sld [smem:[#allocation18_spill]]  ;;  %p1945_p6 = pnand %p1573_p4, %p74_p3 }
  0x13   : > { %s258_s15 = scalar_lea.vmem [#allocation6], %s1080_s10  ;;  %s1949_s17 = sshll.u32 %s256_s7, 3 }
  0x14   : > { %s2453_s14 = scalar_select %p1945_p6, 1, 0 }
  0x15   : > { %s266_s16 = sshll.u32 %s258_s15, 4  ;;  %s1953_s18 = scalar_lea.sflag [#allocation7], %s254_s30  ;;  %s1951_s16 = int_to_ptr.vmem [resolvable:$true] %s266_s16 }
  0x16   : > { %p2446_p8 = pneg %p1945_p6 }
  0x18   : > { %s1943_s13 = scalar_lea.hbm %s2452_s1, %s1081_s8  ;;  %s1641_s29 = scalar_lea.hbm %s2452_s1, 256 }
  0x19   : > { %s1636_s19 = scalar_lea.hbm %s1943_s13, 64  ;;  %p1642_p11 = scmp.lt.u32.totalorder %s1943_s13, %s2452_s1 }
  0x1a   : > { %p1637_p7 = scmp.ne.s32.totalorder %s1943_s13, %s1636_s19  ;;  %p1643_p12 = scmp.lt.u32.totalorder %s1641_s29, %s1636_s19 }
  0x1b   : > { %p1645_p0 = scmp.lt.u32.totalorder %s1636_s19, %s1943_s13 }
  0x1c   : > { %p1639_p9 = pnand %p2446_p8, %p1637_p7  ;;  %p1644_p13 = por %p1643_p12, %p1642_p11 }
  0x1e   : > { %p1640_p10 = pneg %p1639_p9  ;;  %p1646_p1 = por %p1645_p0, %p1644_p13 }
  0x20   : > { %p1647_p2 = pnand %p1646_p1, %p1640_p10 }
  0x22   : > { %1650 = shalt.err (!%p1647_p2)
}
  0x23   : > { %s1651_s30 = scalar_lea.vmem %s1951_s16, 64  ;;  %s1848_s7 = smov [#allocation6]  }
  0x24   : > { %p1652_p3 = scmp.ne.s32.totalorder %s1951_s16, %s1651_s30  ;;  %s1656_s11 = sshll.u32 %s1848_s7, 4  ;;  %s1657_s11 = int_to_ptr.vmem [resolvable:$false] %s1656_s11 }
  0x25   : > { %s1658_s12 = scalar_lea.vmem %s1657_s11, 128  ;;  %p1659_p7 = scmp.lt.s32.totalorder %s1951_s16, %s1657_s11 }
  0x26   : > { %p1654_p4 = pnand %p1652_p3, %p2446_p8  ;;  %p1660_p9 = scmp.lt.s32.totalorder %s1658_s12, %s1651_s30 }
  0x28   : > { %p1655_p5 = pneg %p1654_p4  ;;  %p1661_p11 = por %p1660_p9, %p1659_p7 }
  0x2a   : > { %p1662_p12 = pnand %p1661_p11, %p1655_p5 }
  0x2c   : > { %1665 = shalt.err (!%p1662_p12)
}
  0x2d   : > { %1566 = dma.hbm_to_vmem [thread:$0]  (!%p1945_p6), %s1943_s13, 64, %s1951_s16, %s1953_s18  }
  0x2e   : > { %s1982_s15 = sadd.s32 4294967295, %s1846_s26   ;;  %p78_p10 = scmp.ne.s32.totalorder %s1830_s22, %s1826_s21 }
  0x2f   : > { %p2445_p13 = scmp.eq.s32.totalorder %s1982_s15, 0  ;;  %p1075_p0 = scmp.ge.s32.totalorder %s1846_s26, 1 }
  0x30   : > { %p208_p1 = scmp.lt.s32.totalorder %s1846_s26, 5  ;;  %s1849_s13 = smov [#allocation2]  }
  0x31   : > { %p1991_p2 = por %p2445_p13, %p78_p10  ;;  %s221_s16 = sshll.u32 %s1849_s13, 4  ;;  %s222_s16 = int_to_ptr.vmem [resolvable:$true] %s221_s16 }
  0x32   : > { %p1995_p3 = pnand %p1075_p0, %p208_p1  ;;  %s232_s21 = sshll.u32 %s2442_s4, 4  ;;  %s2004_s21 = int_to_ptr.vmem [resolvable:$true] %s232_s21 }
  0x33   : > { %s2454_s19 = scalar_select %p1991_p2, 1, 0 }
  0x34   : > { %s2455_s20 = scalar_select %p1995_p3, 1, 0 }
  0x35   : > { %p1553_p4 = pneg %p1995_p3  ;;  %s243_s30 = sshll.u32 %s2443_s5, 4  ;;  %s2015_s30 = int_to_ptr.vmem [resolvable:$true] %s243_s30 }
  0x36   : > { %s1666_s28 = scalar_lea.hbm %s2438_s0, 16 }
  0x37   : > { %p2011_p5 = pnand %p1553_p4, %p2445_p13  ;;  %p1667_p7 = scmp.ne.s32.totalorder %s2438_s0, %s1666_s28 }
  0x38   : > { %p1673_p10 = scmp.lt.u32.totalorder %s1666_s28, %s2438_s0 }
  0x39   : > { %p1668_p9 = pneg %p2011_p5 }
  0x3b   : > { %p1669_p11 = pnand %p1668_p9, %p1667_p7 }
  0x3d   : > { %p1670_p12 = pneg %p1669_p11 }
  0x3f   : > { %p1675_p0 = pnand %p1673_p10, %p1670_p12 }
  0x41   : > { %1678 = shalt.err (!%p1675_p0)
}
  0x42   : > { %s1679_s11 = scalar_lea.vmem %s222_s16, 16  ;;  %s1686_s1 = scalar_lea.vmem %s222_s16, 32 }
  0x43   : > { %p1680_p1 = scmp.ne.s32.totalorder %s222_s16, %s1679_s11  ;;  %p1687_p8 = scmp.lt.s32.totalorder %s222_s16, %s222_s16 }
  0x44   : > { %p1688_p2 = scmp.lt.s32.totalorder %s1686_s1, %s1679_s11 }
  0x45   : > { %p1682_p4 = pnand %p1680_p1, %p1668_p9 }
  0x46   : > { %p1689_p3 = por %p1688_p2, %p1687_p8 }
  0x47   : > { %p1683_p13 = pneg %p1682_p4 }
  0x49   : > { %p1690_p6 = pnand %p1689_p3, %p1683_p13 }
  0x4b   : > { %1693 = shalt.err (!%p1690_p6)
}
  0x4c   : > { %1556 = dma.hbm_to_vmem [thread:$0]  (!%p2011_p5), %s2438_s0, 16, %s222_s16, [#allocation3]  }
  0x4d   : > { %s1694_s28 = scalar_lea.vmem %s2004_s21, 16  ;;  %p1702_p8 = scmp.lt.s32.totalorder %s2004_s21, %s2004_s21 }
  0x4e   : > { %p1695_p7 = scmp.ne.s32.totalorder %s2004_s21, %s1694_s28  ;;  %p1703_p13 = scmp.lt.s32.totalorder %s1694_s28, %s1694_s28 }
  0x50   : > { %p1697_p11 = pnand %p1695_p7, %p1668_p9  ;;  %p1704_p6 = por %p1703_p13, %p1702_p8 }
  0x52   : > { %p1698_p12 = pneg %p1697_p11 }
  0x54   : > { %p1705_p2 = pnand %p1704_p6, %p1698_p12 }
  0x56   : > { %1708 = shalt.err (!%p1705_p2)
}
  0x57   : > { %s1850_s11 = smov [#allocation9]   ;;  %s1709_s16 = scalar_lea.vmem %s2015_s30, 16 }
  0x58   : > { %1559 = dma.vmem_to_smem (!%p2011_p5), %s2004_s21, 16, %s1850_s11, [#allocation5]  }
  0x59   : > { %p1710_p3 = scmp.ne.s32.totalorder %s2015_s30, %s1709_s16  ;;  %p1717_p1 = scmp.lt.s32.totalorder %s2015_s30, %s2015_s30 }
  0x5a   : > { %p1718_p4 = scmp.lt.s32.totalorder %s1709_s16, %s1709_s16 }
  0x5b   : > { %p1712_p10 = pnand %p1710_p3, %p1668_p9 }
  0x5c   : > { %p1719_p7 = por %p1718_p4, %p1717_p1 }
  0x5d   : > { %p1713_p0 = pneg %p1712_p10 }
  0x5f   : > { %p1720_p11 = pnand %p1719_p7, %p1713_p0 }
  0x61   : > { %1723 = shalt.err (!%p1720_p11)
}
  0x62   : > { %s1851_s29 = smov [#allocation10]   ;;  %s2457_s21 = sshll.u32 %s1842_s25, 7 }
  0x63   : > { %1562 = dma.vmem_to_smem (!%p2011_p5), %s2015_s30, 16, %s1851_s29, [#allocation11]  }
  0x64   : > { %s2065_s1 = scalar_lea.hbm %s2440_s2, %s2457_s21  ;;  %s277_s12 = scalar_lea.vmem [#allocation8], %s1949_s17 }
  0x65   : > { %s285_s13 = sshll.u32 %s277_s12, 4  ;;  %s1724_s28 = scalar_lea.hbm %s2065_s1, 128  ;;  %s286_s13 = int_to_ptr.vmem [resolvable:$true] %s285_s13 }
  0x66   : > { %p1725_p9 = scmp.ne.s32.totalorder %s2065_s1, %s1724_s28  ;;  %p2458_p12 = scmp.ne.s32.totalorder %s2453_s14, 0 }
  0x67   : > { %s1729_s11 = scalar_lea.hbm %s2440_s2, 512  ;;  %p1730_p5 = scmp.lt.u32.totalorder %s2065_s1, %s2440_s2 }
  0x68   : > { %p2459_p8 = pneg %p2458_p12  ;;  %p1731_p2 = scmp.lt.u32.totalorder %s1729_s11, %s1724_s28 }
  0x69   : > { %p1733_p10 = scmp.lt.u32.totalorder %s1724_s28, %s2065_s1 }
  0x6a   : > { %p1727_p13 = pnand %p1725_p9, %p2459_p8  ;;  %p1732_p3 = por %p1731_p2, %p1730_p5 }
  0x6c   : > { %p1728_p6 = pneg %p1727_p13  ;;  %p1734_p0 = por %p1733_p10, %p1732_p3 }
  0x6e   : > { %p1735_p1 = pnand %p1734_p0, %p1728_p6 }
  0x70   : > { %1738 = shalt.err (!%p1735_p1)
}
  0x71   : > { %s1739_s17 = scalar_lea.vmem %s286_s13, 128  ;;  %p2460_p7 = pmov %p2459_p8 }
  0x72   : > { %p1740_p4 = scmp.ne.s32.totalorder %s286_s13, %s1739_s17  ;;  %s1852_s21 = smov [#allocation8]  }
  0x73   : > { %s1744_s8 = sshll.u32 %s1852_s21, 4  ;;  %s1745_s8 = int_to_ptr.vmem [resolvable:$false] %s1744_s8 }
  0x74   : > { %p1742_p11 = pnand %p1740_p4, %p2460_p7  ;;  %s1746_s10 = scalar_lea.vmem %s1745_s8, 256 }
  0x75   : > { %p1747_p8 = scmp.lt.s32.totalorder %s286_s13, %s1745_s8  ;;  %p1748_p13 = scmp.lt.s32.totalorder %s1746_s10, %s1739_s17 }
  0x76   : > { %p1743_p9 = pneg %p1742_p11 }
  0x77   : > { %p1749_p2 = por %p1748_p13, %p1747_p8 }
  0x79   : > { %p1750_p5 = pnand %p1749_p2, %p1743_p9 }
  0x7b   : > { %1753 = shalt.err (!%p1750_p5)
}
  0x7c   : > { %1569 = dma.hbm_to_vmem [thread:$0]  (!%p2458_p12), %s2065_s1, 128, %s286_s13, %s1953_s18  }
  0x7d   : > { %p2461_p6 = scmp.ne.s32.totalorder %s2455_s20, 0 }
  0x7e   : > { %p2462_p3 = scmp.eq.s32.totalorder (!%p2461_p6), %s1982_s15, 0 }
  0x7f   : > { %304 = sbr.rel (%p2461_p6) target bundleno = 616 (0x268), region = 44 }
  0x86   : > { %1805 = dma.done.wait (%p2462_p3), [#allocation3], 16   ;;  %p2463_p10 = pmov %p2462_p3 }
  0x87   : > { %s310_s12 = sand.u32 1, %s1982_s15   ;;  %s312_s28 = sand.u32 1, %s1830_s22  }
  0x88   : > { %1807 = vsyncadd (%p2463_p10), [#allocation3], 4294967280  ;;  %s1086_s30 = sshll.u32 %s312_s28, 2  ;;  %s311_s7 = scalar_lea.sflag [#allocation7], %s310_s12 }
  0x89   : > { %s2096_s14 = scalar_lea.vmem [#allocation6], %s1086_s30  ;;  %p2464_p0 = scmp.ne.s32.totalorder %s2454_s19, 0 }
  0x8b   : > { %1809 = dma.done.wait (%p2464_p0), %s311_s7, 192  }
  0x8c   : > { %1811 = vsyncadd (%p2464_p0), %s311_s7, 4294967104  ;;  %s1087_s18 = sshll.u32 %s312_s28, 3  ;;  %p2465_p12 = pmov %p2462_p3 }
  0x8d   : > { %s2102_s20 = scalar_lea.vmem [#allocation8], %s1087_s18 }
  0x8e   : > { %1813 = dma.done.wait (%p2465_p12), [#allocation5], 16   ;;  %p2466_p1 = pmov %p2462_p3 }
  0x90   : > { %1815 = vsyncadd (%p2466_p1), [#allocation5], 4294967280  ;;  %p2467_p4 = pmov %p2466_p1 }
  0x91   : > { %p2468_p7 = pmov %p2466_p1 }
  0x92   : > { %1817 = dma.done.wait (%p2467_p4), [#allocation11], 16  }
  0x93   : > { %1819 = vsyncadd (%p2468_p7), [#allocation11], 4294967280 }
  0x94   : > { %336 = sfence }
  0x95   : > { %p368_p11 = scmp.lt.s32.totalorder %s1838_s24, 3  ;;  %p375_p9 = scmp.eq.s32.totalorder %s1838_s24, 0 }
  0x96   : > { %vm381_vm0 = vcmask (%p375_p9), 0   ;;  %v1853_v0 = vmov (%p375_p9), 0.0  }
  0x97   : > { %s369_s19 = scalar_select %p368_p11, %s1838_s24, 3 }
  0x98   : > { %380 = sbr.rel (!%p375_p9) target bundleno = 159 (0x9f), region = 68  ;;  %382 = vst.msk [vmem:[#allocation12] sm:$0x1] (%p375_p9), %vm381_vm0, %v1853_v0 }
  0x99   : > { %s1090_s1 = sshll.u32 %s369_s19, 1 }
  0x9a   : > { %s2118_s16 = scalar_lea.vmem %s2441_s3, %s1090_s1 }
  0x9f PF: > { %v384_v1 = vlaneseq  ;;  %v1854_v2 = vmov 0.0|0.0   ;;  %v2122_v3 = vld [vmem:[%s2096_s14] ss:$0 sm:$0xff]  ;;  %v2128_v5 = vld [vmem:[%s2096_s14 + $0x1] ss:$0 sm:$0xff]  ;;  %vm1855_vm1 = vmmov 0  }
  0xa0   : > { %1437 = vmatprep.subr.bf16.mxu0 %v1854_v2  ;;  %1461 = vmatprep.subr.bf16.mxu1 %v1854_v2  ;;  %v1856_v6 = vmov 0.0   ;;  %v1857_v12 = vmov 1.0|1.0   ;;  %v2268_v23 = vld [vmem:[%s2096_s14 + $0x2] ss:$0 sm:$0xff]  ;;  %s920_s29 = sld [smem:[#allocation9 + %s1838_s24]] }
  0xa1   : > { %v2125_v4 = vshrl.u32 %v384_v1, 7  ;;  %1329 = vmatprep.mubr.msk.f32.mxu0 %vm1855_vm1, %v1856_v6  ;;  %1364 = vmatprep.mubr.msk.f32.mxu1 %vm1855_vm1, %v1856_v6  ;;  %v2272_v24 = vld [vmem:[%s2096_s14 + $0x3] ss:$0 sm:$0xff]  ;;  %v2286_v25 = vld [vmem:[#allocation2] sm:$0x1]  ;;  %s925_s17 = sld [smem:[#allocation10 + %s1838_s24]] }
  0xa2   : > { %v525_v26 = vld [vmem:[%s2102_s20 + $0x4] sm:$0x1]  ;;  %v652_v27 = vld [vmem:[%s2102_s20 + $0x5] sm:$0x1]  ;;  %v524_v29 = vld [vmem:[%s2102_s20] sm:$0x1] }
  0xa3   : > { %v2135_v7 = vadd.s32 8, %v2125_v4  ;;  %vm406_vm2 = vcmp.eq.s32.totalorder %v2125_v4, %v2122_v3  ;;  %v2140_v8 = vadd.s32 16, %v2125_v4  ;;  %vm533_vm3 = vcmp.eq.s32.totalorder %v2125_v4, %v2128_v5  ;;  %v651_v33 = vld [vmem:[%s2102_s20 + $0x1] sm:$0x1]  ;;  %v780_v39 = vld [vmem:[%s2102_s20 + $0x6] sm:$0x1] }
  0xa4   : > { %v2145_v9 = vadd.s32 24, %v2125_v4  ;;  %v2148_v10 = vadd.s32 32, %v2125_v4  ;;  %v2157_v11 = vadd.s32 40, %v2125_v4  ;;  %v2174_v13 = vadd.s32 48, %v2125_v4  ;;  %v908_v40 = vld [vmem:[%s2102_s20 + $0x7] sm:$0x1] }
  0xa5   : > { %vm407_vm4 = vcmp.eq.s32.totalorder %v2135_v7, %v2122_v3  ;;  %vm534_vm5 = vcmp.eq.s32.totalorder %v2135_v7, %v2128_v5  ;;  %vm408_vm6 = vcmp.eq.s32.totalorder %v2140_v8, %v2122_v3  ;;  %vm535_vm9 = vcmp.eq.s32.totalorder %v2140_v8, %v2128_v5  ;;  %v779_v42 = vld [vmem:[%s2102_s20 + $0x2] sm:$0x1]  ;;  %v907_v46 = vld [vmem:[%s2102_s20 + $0x3] sm:$0x1]  ;;  %v913_v52 = vld [vmem:[%s2118_s16 + $0x1] sm:$0x1] }
  0xa6   : > { %vm1438_vm7 = vmpackc.low %vm407_vm4, %vm406_vm2  ;;  %vm409_vm8 = vcmp.eq.s32.totalorder %v2145_v9, %v2122_v3  ;;  %vm536_vm10 = vcmp.eq.s32.totalorder %v2145_v9, %v2128_v5  ;;  %vm410_vm14 = vcmp.eq.s32.totalorder %v2148_v10, %v2122_v3  ;;  %vm411_vm15 = vcmp.eq.s32.totalorder %v2157_v11, %v2122_v3  ;;  %v912_v54 = vld [vmem:[%s2118_s16] sm:$0x1]  ;;  %v924_v58 = vld [vmem:[#allocation12] sm:$0x1]  ;;  %s1858_s8 = smov [#allocation12]   ;;  %p1577_p8 = scmp.eq.s32.totalorder %s1982_s15, 3 }
  0xa7   : > { %1439 = vmatpush3.bf16.msk.msra.mxu0 %vm1438_vm7, %v1857_v12  ;;  %vm1462_vm11 = vmpackc.low %vm534_vm5, %vm533_vm3  ;;  %v2177_v14 = vadd.s32 56, %v2125_v4  ;;  %vm537_vm0 = vcmp.eq.s32.totalorder %v2148_v10, %v2128_v5  ;;  %vm538_vm2 = vcmp.eq.s32.totalorder %v2157_v11, %v2128_v5  ;;  %vm412_vm5 = vcmp.eq.s32.totalorder %v2174_v13, %v2122_v3  ;;  %s926_s21 = smul.f32 %s925_s17, %s920_s29  ;;  %s944_s10 = sshll.u32 %s1858_s8, 4  ;;  %s945_s10 = int_to_ptr.vmem [resolvable:$true] %s944_s10 }
  0xa8   : > { %1463 = vmatpush3.bf16.msk.msra.mxu1 %vm1462_vm11, %v1857_v12  ;;  %1440 = vmatprep.subr.bf16.mxu0 %v1854_v2  ;;  %vm1441_vm12 = vmpackc.low %vm409_vm8, %vm408_vm6  ;;  %v2192_v15 = vadd.s32 64, %v2125_v4  ;;  %v2195_v16 = vadd.s32 72, %v2125_v4  ;;  %vm539_vm7 = vcmp.eq.s32.totalorder %v2174_v13, %v2128_v5  ;;  %v2210_v17 = vadd.s32 80, %v2125_v4  ;;  %s1754_s24 = scalar_lea.vmem %s945_s10, 16  ;;  %s1760_s12 = scalar_lea.vmem %s945_s10, 32 }
  0xa9   : > { %1464 = vmatprep.subr.bf16.mxu1 %v1854_v2  ;;  %vm1465_vm13 = vmpackc.low %vm536_vm10, %vm535_vm9  ;;  %vm413_vm6 = vcmp.eq.s32.totalorder %v2177_v14, %v2122_v3  ;;  %vm540_vm8 = vcmp.eq.s32.totalorder %v2177_v14, %v2128_v5  ;;  %v2213_v18 = vadd.s32 88, %v2125_v4  ;;  %v2228_v19 = vadd.s32 96, %v2125_v4  ;;  %p1755_p13 = scmp.ne.s32.totalorder %s945_s10, %s1754_s24  ;;  %p1761_p6 = scmp.lt.s32.totalorder %s945_s10, %s945_s10 }
  0xaa   : > { %vm1444_vm3 = vmpackc.low %vm411_vm15, %vm410_vm14  ;;  %vm414_vm11 = vcmp.eq.s32.totalorder %v2192_v15, %v2122_v3  ;;  %vm542_vm14 = vcmp.eq.s32.totalorder %v2195_v16, %v2128_v5  ;;  %v2231_v20 = vadd.s32 104, %v2125_v4  ;;  %v2246_v21 = vadd.s32 112, %v2125_v4  ;;  %p1762_p3 = scmp.lt.s32.totalorder %s1760_s12, %s1754_s24 }
  0xab   : > { %1442 = vmatpush3.bf16.msk.msra.mxu0 %vm1441_vm12, %v1857_v12  ;;  %vm1468_vm4 = vmpackc.low %vm538_vm2, %vm537_vm0  ;;  %vm415_vm12 = vcmp.eq.s32.totalorder %v2195_v16, %v2122_v3  ;;  %vm416_vm2 = vcmp.eq.s32.totalorder %v2210_v17, %v2122_v3  ;;  %v2249_v22 = vadd.s32 120, %v2125_v4  ;;  %v927_v59 = vstv %s926_s21  ;;  %p1756_p2 = pnand %p1755_p13, %p1577_p8 }
  0xac   : > { %1466 = vmatpush3.bf16.msk.msra.mxu1 %vm1465_vm13, %v1857_v12  ;;  %1443 = vmatprep.subr.bf16.mxu0 %v1854_v2  ;;  %vm1447_vm9 = vmpackc.low %vm413_vm6, %vm412_vm5  ;;  %vm541_vm13 = vcmp.eq.s32.totalorder %v2192_v15, %v2128_v5  ;;  %vm544_vm5 = vcmp.eq.s32.totalorder %v2213_v18, %v2128_v5  ;;  %v928_v60 = vadd.f32 %v927_v59, %v924_v58  ;;  %v932_v61 = vstv %s920_s29  ;;  %p1763_p10 = por %p1762_p3, %p1761_p6 }
  0xad   : > { %1467 = vmatprep.subr.bf16.mxu1 %v1854_v2  ;;  %vm1471_vm10 = vmpackc.low %vm540_vm8, %vm539_vm7  ;;  %vm418_vm8 = vcmp.eq.s32.totalorder %v2228_v19, %v2122_v3  ;;  %p1757_p5 = pneg %p1756_p2 }
  0xae   : > { %vm1450_vm15 = vmpackc.low %vm415_vm12, %vm414_vm11  ;;  %vm546_vm11 = vcmp.eq.s32.totalorder %v2231_v20, %v2128_v5 }
  0xaf   : > { %1445 = vmatpush3.bf16.msk.msra.mxu0 %vm1444_vm3, %v1857_v12  ;;  %vm1474_vm0 = vmpackc.low %vm542_vm14, %vm541_vm13  ;;  %vm417_vm3 = vcmp.eq.s32.totalorder %v2213_v18, %v2122_v3  ;;  %vm420_vm14 = vcmp.eq.s32.totalorder %v2246_v21, %v2122_v3  ;;  %p1764_p0 = pnand %p1763_p10, %p1757_p5 }
  0xb0   : > { %1469 = vmatpush3.bf16.msk.msra.mxu1 %vm1468_vm4, %v1857_v12  ;;  %1446 = vmatprep.subr.bf16.mxu0 %v1854_v2  ;;  %vm543_vm4 = vcmp.eq.s32.totalorder %v2210_v17, %v2128_v5  ;;  %vm1453_vm6 = vmpackc.low %vm417_vm3, %vm416_vm2  ;;  %vm548_vm2 = vcmp.eq.s32.totalorder %v2249_v22, %v2128_v5 }
  0xb1   : > { %1470 = vmatprep.subr.bf16.mxu1 %v1854_v2  ;;  %vm1477_vm7 = vmpackc.low %vm544_vm5, %vm543_vm4  ;;  %vm661_vm5 = vcmp.eq.s32.totalorder %v2125_v4, %v2268_v23 }
  0xb3   : > { %1448 = vmatpush3.bf16.msk.msra.mxu0 %vm1447_vm9, %v1857_v12  ;;  %vm419_vm9 = vcmp.eq.s32.totalorder %v2231_v20, %v2122_v3 }
  0xb4   : > { %1472 = vmatpush3.bf16.msk.msra.mxu1 %vm1471_vm10, %v1857_v12  ;;  %1449 = vmatprep.subr.bf16.mxu0 %v1854_v2  ;;  %vm545_vm10 = vcmp.eq.s32.totalorder %v2228_v19, %v2128_v5  ;;  %vm1456_vm12 = vmpackc.low %vm419_vm9, %vm418_vm8  ;;  %vm790_vm8 = vcmp.eq.s32.totalorder %v2135_v7, %v2272_v24 }
  0xb5   : > { %1473 = vmatprep.subr.bf16.mxu1 %v1854_v2  ;;  %vm1480_vm13 = vmpackc.low %vm546_vm11, %vm545_vm10  ;;  %vm663_vm11 = vcmp.eq.s32.totalorder %v2140_v8, %v2268_v23 }
  0xb7   : > { %1451 = vmatpush3.bf16.msk.msra.mxu0 %vm1450_vm15, %v1857_v12  ;;  %vm421_vm15 = vcmp.eq.s32.totalorder %v2249_v22, %v2122_v3 }
  0xb8   : > { %1475 = vmatpush3.bf16.msk.msra.mxu1 %vm1474_vm0, %v1857_v12  ;;  %1452 = vmatprep.subr.bf16.mxu0 %v1854_v2  ;;  %vm547_vm0 = vcmp.eq.s32.totalorder %v2246_v21, %v2128_v5  ;;  %vm1459_vm3 = vmpackc.low %vm421_vm15, %vm420_vm14  ;;  %vm792_vm14 = vcmp.eq.s32.totalorder %v2145_v9, %v2272_v24 }
  0xb9   : > { %1476 = vmatprep.subr.bf16.mxu1 %v1854_v2  ;;  %vm1483_vm4 = vmpackc.low %vm548_vm2, %vm547_vm0  ;;  %vm665_vm2 = vcmp.eq.s32.totalorder %v2148_v10, %v2268_v23 }
  0xbb   : > { %1454 = vmatpush3.bf16.msk.msra.mxu0 %vm1453_vm6, %v1857_v12  ;;  %vm662_vm6 = vcmp.eq.s32.totalorder %v2135_v7, %v2268_v23 }
  0xbc   : > { %1478 = vmatpush3.bf16.msk.msra.mxu1 %vm1477_vm7, %v1857_v12  ;;  %1455 = vmatprep.subr.bf16.mxu0 %v1854_v2  ;;  %vm789_vm7 = vcmp.eq.s32.totalorder %v2125_v4, %v2272_v24  ;;  %vm1486_vm9 = vmpackc.low %vm662_vm6, %vm661_vm5  ;;  %vm794_vm5 = vcmp.eq.s32.totalorder %v2157_v11, %v2272_v24 }
  0xbd   : > { %1479 = vmatprep.subr.bf16.mxu1 %v1854_v2  ;;  %vm1510_vm10 = vmpackc.low %vm790_vm8, %vm789_vm7  ;;  %vm667_vm8 = vcmp.eq.s32.totalorder %v2174_v13, %v2268_v23 }
  0xbf   : > { %1457 = vmatpush3.bf16.msk.msra.mxu0 %vm1456_vm12, %v1857_v12  ;;  %vm664_vm12 = vcmp.eq.s32.totalorder %v2145_v9, %v2268_v23 }
  0xc0   : > { %1481 = vmatpush3.bf16.msk.msra.mxu1 %vm1480_vm13, %v1857_v12  ;;  %1458 = vmatprep.subr.bf16.mxu0 %v1854_v2  ;;  %vm791_vm13 = vcmp.eq.s32.totalorder %v2140_v8, %v2272_v24  ;;  %vm1489_vm15 = vmpackc.low %vm664_vm12, %vm663_vm11 }
  0xc1   : > { %1482 = vmatprep.subr.bf16.mxu1 %v1854_v2  ;;  %vm1513_vm0 = vmpackc.low %vm792_vm14, %vm791_vm13  ;;  %vm669_vm13 = vcmp.eq.s32.totalorder %v2192_v15, %v2268_v23  ;;  %vm670_vm14 = vcmp.eq.s32.totalorder %v2195_v16, %v2268_v23 }
  0xc3   : > { %1460 = vmatpush3.bf16.msk.msra.mxu0 %vm1459_vm3, %v1857_v12  ;;  %vm666_vm3 = vcmp.eq.s32.totalorder %v2157_v11, %v2268_v23 }
  0xc4   : > { %1484 = vmatpush3.bf16.msk.msra.mxu1 %vm1483_vm4, %v1857_v12  ;;  %1485 = vmatprep.subr.bf16.mxu0 %v1854_v2  ;;  %vm793_vm4 = vcmp.eq.s32.totalorder %v2148_v10, %v2272_v24  ;;  %vm1492_vm6 = vmpackc.low %vm666_vm3, %vm665_vm2 }
  0xc5   : > { %1509 = vmatprep.subr.bf16.mxu1 %v1854_v2  ;;  %vm1516_vm7 = vmpackc.low %vm794_vm5, %vm793_vm4  ;;  %vm671_vm4 = vcmp.eq.s32.totalorder %v2210_v17, %v2268_v23  ;;  %vm672_vm5 = vcmp.eq.s32.totalorder %v2213_v18, %v2268_v23 }
  0xc6   : > { %1330 = vmatmul.mubr.f32.vlgmr.msra.gmra.mrb[0].mxu0 %v2286_v25  ;;  %vm1498_vm2 = vmpackc.low %vm670_vm14, %vm669_vm13 }
  0xc7   : > { %1365 = vmatmul.mubr.f32.vlgmr.msra.gmra.mrb[0].mxu1 %v2286_v25  ;;  %1487 = vmatpush3.bf16.msk.msra.mxu0 %vm1486_vm9, %v1857_v12  ;;  %vm668_vm9 = vcmp.eq.s32.totalorder %v2177_v14, %v2268_v23 }
  0xc8   : > { %1511 = vmatpush3.bf16.msk.msra.mxu1 %vm1510_vm10, %v1857_v12  ;;  %1488 = vmatprep.subr.bf16.mxu0 %v1854_v2  ;;  %vm795_vm10 = vcmp.eq.s32.totalorder %v2174_v13, %v2272_v24  ;;  %vm1495_vm11 = vmpackc.low %vm668_vm9, %vm667_vm8 }
  0xc9   : > { %1512 = vmatprep.subr.bf16.mxu1 %v1854_v2  ;;  %1399 = vmatprep.mubr.msk.f32.mxu0 %vm1855_vm1, %v1856_v6  ;;  %vm1501_vm8 = vmpackc.low %vm672_vm5, %vm671_vm4 }
  0xca   : > { %1434 = vmatprep.mubr.msk.f32.mxu1 %vm1855_vm1, %v1856_v6  ;;  %vm796_vm1 = vcmp.eq.s32.totalorder %v2177_v14, %v2272_v24 }
  0xcb   : > { %1490 = vmatpush3.bf16.msk.msra.mxu0 %vm1489_vm15, %v1857_v12  ;;  %vm1519_vm12 = vmpackc.low %vm796_vm1, %vm795_vm10  ;;  %vm797_vm15 = vcmp.eq.s32.totalorder %v2192_v15, %v2272_v24  ;;  %vm673_vm10 = vcmp.eq.s32.totalorder %v2228_v19, %v2268_v23  ;;  %vm674_vm1 = vcmp.eq.s32.totalorder %v2231_v20, %v2268_v23 }
  0xcc   : > { %1514 = vmatpush3.bf16.msk.msra.mxu1 %vm1513_vm0, %v1857_v12  ;;  %1491 = vmatprep.subr.bf16.mxu0 %v1854_v2  ;;  %vm798_vm0 = vcmp.eq.s32.totalorder %v2195_v16, %v2272_v24  ;;  %vm1504_vm13 = vmpackc.low %vm674_vm1, %vm673_vm10 }
  0xcd   : > { %1515 = vmatprep.subr.bf16.mxu1 %v1854_v2  ;;  %vm1522_vm3 = vmpackc.low %vm798_vm0, %vm797_vm15  ;;  %vm675_vm15 = vcmp.eq.s32.totalorder %v2246_v21, %v2268_v23  ;;  %vm676_vm0 = vcmp.eq.s32.totalorder %v2249_v22, %v2268_v23 }
  0xce   : > { %vm1507_vm4 = vmpackc.low %vm676_vm0, %vm675_vm15 }
  0xcf   : > { %1493 = vmatpush3.bf16.msk.msra.mxu0 %vm1492_vm6, %v1857_v12  ;;  %vm799_vm6 = vcmp.eq.s32.totalorder %v2210_v17, %v2272_v24 }
  0xd0   : > { %1517 = vmatpush3.bf16.msk.msra.mxu1 %vm1516_vm7, %v1857_v12  ;;  %1494 = vmatprep.subr.bf16.mxu0 %v1854_v2  ;;  %vm800_vm7 = vcmp.eq.s32.totalorder %v2213_v18, %v2272_v24 }
  0xd1   : > { %1518 = vmatprep.subr.bf16.mxu1 %v1854_v2  ;;  %vm1525_vm9 = vmpackc.low %vm800_vm7, %vm799_vm6  ;;  %vm916_vm6 = vcmask 1040384   ;;  %vm929_vm7 = vcmask 0  }
  0xd2   : > { %930 = vst.msk [vmem:[#allocation12] sm:$0x1] %vm929_vm7, %v928_v60 }
  0xd3   : > { %1496 = vmatpush3.bf16.msk.msra.mxu0 %vm1495_vm11, %v1857_v12  ;;  %vm801_vm11 = vcmp.eq.s32.totalorder %v2228_v19, %v2272_v24 }
  0xd4   : > { %1520 = vmatpush3.bf16.msk.msra.mxu1 %vm1519_vm12, %v1857_v12  ;;  %1497 = vmatprep.subr.bf16.mxu0 %v1854_v2  ;;  %vm802_vm12 = vcmp.eq.s32.totalorder %v2231_v20, %v2272_v24 }
  0xd5   : > { %1521 = vmatprep.subr.bf16.mxu1 %v1854_v2  ;;  %vm1528_vm14 = vmpackc.low %vm802_vm12, %vm801_vm11 }
  0xd7   : > { %1499 = vmatpush3.bf16.msk.msra.mxu0 %vm1498_vm2, %v1857_v12  ;;  %vm803_vm2 = vcmp.eq.s32.totalorder %v2246_v21, %v2272_v24 }
  0xd8   : > { %1523 = vmatpush3.bf16.msk.msra.mxu1 %vm1522_vm3, %v1857_v12  ;;  %1500 = vmatprep.subr.bf16.mxu0 %v1854_v2  ;;  %vm804_vm3 = vcmp.eq.s32.totalorder %v2249_v22, %v2272_v24 }
  0xd9   : > { %1524 = vmatprep.subr.bf16.mxu1 %v1854_v2  ;;  %vm1531_vm5 = vmpackc.low %vm804_vm3, %vm803_vm2  ;;  %v931_v63 = vld [vmem:[#allocation12] sm:$0x1] }
  0xdb   : > { %1502 = vmatpush3.bf16.msk.msra.mxu0 %vm1501_vm8, %v1857_v12 }
  0xdc   : > { %1526 = vmatpush3.bf16.msk.msra.mxu1 %vm1525_vm9, %v1857_v12  ;;  %1503 = vmatprep.subr.bf16.mxu0 %v1854_v2 }
  0xdd   : > { %1527 = vmatprep.subr.bf16.mxu1 %v1854_v2 }
  0xdf   : > { %1505 = vmatpush3.bf16.msk.msra.mxu0 %vm1504_vm13, %v1857_v12 }
  0xe0   : > { %1529 = vmatpush3.bf16.msk.msra.mxu1 %vm1528_vm14, %v1857_v12  ;;  %1506 = vmatprep.subr.bf16.mxu0 %v1854_v2 }
  0xe1   : > { %1530 = vmatprep.subr.bf16.mxu1 %v1854_v2 }
  0xe3   : > { %1508 = vmatpush3.bf16.msk.msra.mxu0 %vm1507_vm4, %v1857_v12 }
  0xe4   : > { %1532 = vmatpush3.bf16.msk.msra.mxu1 %vm1531_vm5, %v1857_v12 }
  0xe6   : > { %1400 = vmatmul.mubr.f32.vlgmr.msra.gmra.mrb[2].mxu0 %v2286_v25 }
  0xe7   : > { %1435 = vmatmul.mubr.f32.vlgmr.msra.gmra.mrb[2].mxu1 %v2286_v25 }
 0x199   : > { %v520_v28 = vpop.f32.mrb[0].mxu0 }
 0x19a   : > { %v526_v30 = vmul.f32 %v525_v26, %v520_v28  ;;  %v1331_v31 = vpop.f32.mrb[1].mxu0  ;;  %v647_v32 = vpop.f32.mrb[0].mxu1 }
 0x19b   : > { %v653_v34 = vmul.f32 %v652_v27, %v647_v32  ;;  %v1366_v35 = vpop.f32.mrb[1].mxu1 }
 0x19c   : > { %v527_v36 = vadd.f32 %v526_v30, %v524_v29 }
 0x19d   : > { %v654_v37 = vadd.f32 %v653_v34, %v651_v33 }
 0x19f   : > { %v655_v38 = vmul.f32 %v654_v37, %v527_v36 }
 0x1b9   : > { %v775_v41 = vpop.f32.mrb[2].mxu0 }
 0x1ba   : > { %v781_v43 = vmul.f32 %v780_v39, %v775_v41  ;;  %v1401_v44 = vpop.f32.mrb[3].mxu0  ;;  %v903_v45 = vpop.f32.mrb[2].mxu1 }
 0x1bb   : > { %v909_v47 = vmul.f32 %v908_v40, %v903_v45  ;;  %v1436_v48 = vpop.f32.mrb[3].mxu1 }
 0x1bc   : > { %v782_v49 = vadd.f32 %v781_v43, %v779_v42 }
 0x1bd   : > { %v910_v50 = vadd.f32 %v909_v47, %v907_v46 }
 0x1be   : > { %v783_v51 = vmul.f32 %v782_v49, %v655_v38 }
 0x1c0   : > { %v911_v53 = vmul.f32 %v910_v50, %v783_v51 }
 0x1c2   : > { %v914_v55 = vmul.f32 %v913_v52, %v911_v53 }
 0x1c4   : > { %v915_v56 = vadd.f32 %v914_v55, %v912_v54 }
 0x1c6   : > { %v917_v57 = vsel %vm916_vm6, %v915_v56, 0.0 }
 0x1c7   : > { %918 = vadd.xlane.f32.xlu0 %v917_v57 }
 0x254   : > { %v919_v62 = vpop.xlane.xlu0 %918 }
 0x255   : > { %v933_v0 = vmul.f32 %v932_v61, %v919_v62 }
 0x257   : > { %v934_v1 = vadd.f32 %v933_v0, %v931_v63 }
 0x259   : > { %936 = vst.msk [vmem:[#allocation12] sm:$0x1] %vm929_vm7, %v934_v1 }
 0x25a   : > { %1767 = shalt.err (!%p1764_p0)
}
 0x25b   : > { %s1768_s7 = scalar_lea.hbm %s2444_s6, 16 }
 0x25c   : > { %p1769_p12 = scmp.ne.s32.totalorder %s2444_s6, %s1768_s7  ;;  %p1774_p7 = scmp.lt.u32.totalorder %s1768_s7, %s2444_s6 }
 0x25e   : > { %p1770_p1 = pnand %p1769_p12, %p1577_p8 }
 0x260   : > { %p1771_p4 = pneg %p1770_p1 }
 0x262   : > { %p1776_p11 = pnand %p1774_p7, %p1771_p4 }
 0x264   : > { %1779 = shalt.err (!%p1776_p11)
}
 0x265   : > { %1550 = dma.vmem_to_hbm [thread:$0]  (%p1577_p8), %s945_s10, 16, %s2444_s6, [#allocation4]  }
 0x266   : > { %1821 = dma.done.wait (%p1577_p8), [#allocation4], 16  }
 0x267   : > { %1823 = vsyncadd (%p1577_p8), [#allocation4], 4294967280 }
 0x268 PF: > { %s23_s26 = sadd.s32 1, %s1846_s26   ;;  %s2469_s21 = smov %s1830_s22 }
 0x269   : > { %p20_p9 = scmp.ge.s32.totalorder %s23_s26, 6   ;;  %s2470_s22 = smov %s1834_s23 }
 0x26a   : > { %s2471_s23 = smov %s1938_s9  ;;  %s2472_s24 = smov %s1842_s25 }
 0x26b   : > { %s2473_s25 = smov %s2475_s27  ;;  %22 = sbr.rel (!%p20_p9) target bundleno = 10 (0xa), region = 117 }
 0x272   :  { %957 = vsyncpa [#allocation3], 1 }
 0x273   :  { %959 = vsyncpa [#allocation3 + $0x1], 1 }
 0x274   :  { %960 = vsyncpa [#allocation7], 1 }
 0x275   :  { %962 = vsyncpa [#allocation7 + $0x1], 1 }
 0x276   :  { %963 = vsyncpa [#allocation4], 1 }
 0x277   :  { %965 = vsyncpa [#allocation4 + $0x1], 1 }
 0x278   :  { %966 = vsyncpa [#allocation5], 1 }
 0x279   :  { %968 = vsyncpa [#allocation5 + $0x1], 1 }
 0x27a   :  { %969 = vsyncpa [#allocation11], 1 }

</bundles_post_ra>
